<compile_context>
chip_gen: v7x
topology: tpu7x:2x2x1
jax: 0.10.0
libtpu: 0.0.40
codegen_flags: <defaults>
</compile_context>

<pallas_src>
import functools

import jax
import jax.numpy as jnp
from jax.experimental import pallas as pl
from jax.experimental.pallas import tpu as pltpu


def _fused_kernel(s_ref, x_ref, w_ref, o_ref):
    """One grid step over an output-channel tile.

       s_ref: (C_in, 1)   raw gate logits (resident, DMA'd once)
       x_ref: (C_in, HW)  activations, channel-major (resident, DMA'd once)
       w_ref: (tm, C_in)  bf16 weight rows for this tile (streamed)
       o_ref: (tm, HW)    output tile
    """
    # Per-input-channel sigmoid gate (EUP) in f32, applied to the resident
    # activations; cast the gated RHS to bf16 so the MXU runs bf16 x bf16.
    gate = jax.nn.sigmoid(s_ref[...].astype(jnp.float32))                # (C_in, 1)
    gx = (x_ref[...].astype(jnp.float32) * gate).astype(jnp.bfloat16)    # (C_in, HW)

    # One MXU dot per grid step with f32 accumulation.
    o_ref[...] = jnp.dot(w_ref[...], gx,
                         preferred_element_type=jnp.float32).astype(o_ref.dtype)


def prepare_conv1x1_weight(weight):
    """One-time (init-time) weight prep, OUTSIDE the hot path:
       (C_out, C_in, 1, 1) f32 -> (C_out, C_in) bf16.
       The kernel then streams it straight from HBM with no pad/cast/copy."""
    c_out, c_in = weight.shape[0], weight.shape[1]
    return weight.reshape(c_out, c_in).astype(jnp.bfloat16)


@functools.partial(jax.jit, static_argnames=("tm",))
def sigmoid_mul_conv1x1(x419, x415, w2d, *, tm=368):
    """x419: (1, C_in, 1, 1) gate logits
       x415: (1, C_in, H, W) activations
       w2d : (C_out, C_in)   prepared (bf16) 1x1-conv weight
       returns (1, C_out, H, W)
    """
    n, c_in, h, w = x415.shape
    c_out = w2d.shape[0]
    assert n == 1 and x419.shape == (n, c_in, 1, 1)
    assert w2d.shape == (c_out, c_in)

    hw = h * w
    # With n == 1, NCHW.reshape(C, H*W) is already the matmul layout -> free.
    x2 = x415.reshape(c_in, hw)
    s2 = x419.reshape(c_in, 1)

    # Output-channel tile: a multiple of 8 (sublane) unless a single full block.
    tm = min(tm, c_out)
    if tm != c_out:
        tm = max(8, (tm // 8) * 8)
    grid_m = pl.cdiv(c_out, tm)   # last block may be partial; Pallas masks it.

    itemsize = x415.dtype.itemsize
    cost = pl.CostEstimate(
        flops=2 * c_out * c_in * hw,
        transcendentals=c_in * grid_m,                  # sigmoid recomputed per step
        bytes_accessed=(w2d.size * w2d.dtype.itemsize   # weight, streamed once
                        + c_in * hw * itemsize          # activations, once
                        + c_in * itemsize               # gate logits, once
                        + c_out * hw * itemsize),       # output
    )

    out = pl.pallas_call(
        _fused_kernel,
        out_shape=jax.ShapeDtypeStruct((c_out, hw), x415.dtype),
        grid_spec=pltpu.PrefetchScalarGridSpec(
            num_scalar_prefetch=0,
            grid=(grid_m,),
            in_specs=[
                pl.BlockSpec((c_in, 1), lambda i: (0, 0)),    # gate logits (resident)
                pl.BlockSpec((c_in, hw), lambda i: (0, 0)),   # activations (resident)
                pl.BlockSpec((tm, c_in), lambda i: (i, 0)),   # weight rows (streamed)
            ],
            out_specs=pl.BlockSpec((tm, hw), lambda i: (i, 0)),
        ),
        compiler_params=pltpu.CompilerParams(
            dimension_semantics=("parallel",),
            vmem_limit_bytes=48 * 1024 * 1024,   # safe on v5e/v6e (128 MiB) and v7x (64 MiB)
        ),
        cost_estimate=cost,
    )(s2, x2, w2d)

    # Pure reshape (no transpose, no slice) back to NCHW.
    return out.reshape(n, c_out, h, w)


if __name__ == "__main__":
    # Small stand-in for the real (1, 2904, 14, 14): keep H=W=14 and a channel
    # count that (like 2904) is a multiple of 8 but NOT of 128.
    N, C, H, W = 1, 296, 14, 14

    key = jax.random.PRNGKey(0)
    k1, k2, k3 = jax.random.split(key, 3)
    x415 = jax.random.normal(k1, (N, C, H, W), dtype=jnp.float32)
    x419 = jax.random.normal(k2, (N, C, 1, 1), dtype=jnp.float32)
    weight = jax.random.normal(k3, (C, C, 1, 1), dtype=jnp.float32) / jnp.sqrt(C)

    # One-time weight prep (outside the hot path).
    w2d = prepare_conv1x1_weight(weight)

    # tm=128 -> 3 grid steps (last one partial), exercising the same streamed /
    # masked-boundary path the real C_out=2904, tm=368 (8 steps) default takes.
    out = jax.block_until_ready(sigmoid_mul_conv1x1(x419, x415, w2d, tm=128))

    # Pure-JAX reference (same semantics as the torch module).
    gated = jax.nn.sigmoid(x419) * x415                               # (N, C, H, W)
    ref = jnp.einsum("nchw,oc->nohw", gated, weight.reshape(C, C))

    assert out.shape == (N, C, H, W)
    max_err = float(jnp.max(jnp.abs(out - ref)))
    # Tolerance covers bf16 weight storage + TPU default (bf16-pass) matmul.
    assert jnp.allclose(out, ref, atol=2e-2, rtol=2e-2), max_err
    print("KERNEL_OK")
</pallas_src>

<mosaic_0001>
module attributes {stable_mosaic.version = 11 : i64} {
  func.func @_fused_kernel(%arg0: i32, %arg1: memref<296x1xf32, #tpu.memory_space<vmem>>, %arg2: memref<296x196xf32, #tpu.memory_space<vmem>>, %arg3: memref<128x296xbf16, #tpu.memory_space<vmem>>, %arg4: memref<128x196xf32, #tpu.memory_space<vmem>>) attributes {dimension_semantics = [#tpu.dimension_semantics<parallel>], iteration_bounds = array<i64: 3>, scalar_prefetch = 0 : i64, scratch_operands = 0 : i64, tpu.core_type = #tpu.core_type<tc>, window_params = [{pipeline_mode = #tpu.pipeline_mode<synchronous>, transform_indices = @transform_0, window_bounds = array<i64: 296, 1>}, {pipeline_mode = #tpu.pipeline_mode<synchronous>, transform_indices = @transform_1, window_bounds = array<i64: 296, 196>}, {transform_indices = @transform_2, window_bounds = array<i64: 128, 296>}, {transform_indices = @transform_3, window_bounds = array<i64: 128, 196>}]} {
    %c0 = arith.constant 0 : index
    %c0_0 = arith.constant 0 : index
    %0 = vector.load %arg1[%c0, %c0_0] : memref<296x1xf32, #tpu.memory_space<vmem>>, vector<296x1xf32>
    %1 = arith.negf %0 : vector<296x1xf32>
    %2 = math.exp %1 : vector<296x1xf32>
    %cst = arith.constant 1.000000e+00 : f32
    %3 = vector.broadcast %cst : f32 to vector<296x1xf32>
    %4 = arith.addf %3, %2 : vector<296x1xf32>
    %5 = arith.divf %3, %4 : vector<296x1xf32>
    %c0_1 = arith.constant 0 : index
    %c0_2 = arith.constant 0 : index
    %6 = vector.load %arg2[%c0_1, %c0_2] : memref<296x196xf32, #tpu.memory_space<vmem>>, vector<296x196xf32>
    %7 = vector.broadcast %5 : vector<296x1xf32> to vector<296x196xf32>
    %8 = arith.mulf %6, %7 : vector<296x196xf32>
    %9 = arith.truncf %8 : vector<296x196xf32> to vector<296x196xbf16>
    %c0_3 = arith.constant 0 : index
    %c0_4 = arith.constant 0 : index
    %10 = vector.load %arg3[%c0_3, %c0_4] : memref<128x296xbf16, #tpu.memory_space<vmem>>, vector<128x296xbf16>
    %cst_5 = arith.constant dense<0.000000e+00> : vector<128x196xf32>
    %11 = tpu.matmul %10, %9, %cst_5 {dimension_numbers = #tpu.dot_dimension_numbers<[1], [0], [0], [1], [0, 0, 1, 1], [], []>} : vector<128x296xbf16>, vector<296x196xbf16>, vector<128x196xf32> -> vector<128x196xf32>
    %c0_6 = arith.constant 0 : index
    %c0_7 = arith.constant 0 : index
    %12 = vector.load %arg4[%c0_6, %c0_7] : memref<128x196xf32, #tpu.memory_space<vmem>>, vector<128x196xf32>
    tpu.vector_store %arg4[%c0_6, %c0_7], %11 {strides = array<i32>} : memref<128x196xf32, #tpu.memory_space<vmem>>, vector<128x196xf32>,
    return
  }
  func.func @transform_0(%arg0: i32) -> (i32, i32) {
    %c0_i32 = arith.constant 0 : i32
    %c0_i32_0 = arith.constant 0 : i32
    %c0_i32_1 = arith.constant 0 : i32
    return %c0_i32, %c0_i32_0 : i32, i32
  }
  func.func @transform_1(%arg0: i32) -> (i32, i32) {
    %c0_i32 = arith.constant 0 : i32
    %c0_i32_0 = arith.constant 0 : i32
    %c0_i32_1 = arith.constant 0 : i32
    return %c0_i32, %c0_i32_0 : i32, i32
  }
  func.func @transform_2(%arg0: i32) -> (i32, i32) {
    %c0_i32 = arith.constant 0 : i32
    %c0_i32_0 = arith.constant 0 : i32
    return %arg0, %c0_i32 : i32, i32
  }
  func.func @transform_3(%arg0: i32) -> (i32, i32) {
    %c0_i32 = arith.constant 0 : i32
    %c0_i32_0 = arith.constant 0 : i32
    return %arg0, %c0_i32 : i32, i32
  }
}

</mosaic_0001>

<bundles_post_ra>
// kernel: sigmoid_mul_conv1x1.1
= control target key start
LH: loop header
LB: loop body
LE: loop exit
PB: predicated region body
PF: predicated region fallthrough
CT: control target
= control target key end

     0   :  { %s2009_s12 = smov 0   ;;  %s2011_s13 = smov 0   ;;  %s2617_s0 = inlined_call_operand.vmem [shape: f32[296,1], index: 0, kind: input, shape index: {}]   ;;  %s2618_s1 = inlined_call_operand.vmem [shape: f32[296,196], index: 1, kind: input, shape index: {}]   ;;  %s2619_s2 = inlined_call_operand.vmem [shape: bf16[296,296], index: 2, kind: input, shape index: {}]   ;;  %s2620_s3 = inlined_call_operand.vmem [shape: f32[296,196], index: 3, kind: output, shape index: {}]  }
   0x1   :  { %s2013_s14 = smov 0  }
   0x2 LB: > { %s2022_s15 = sadd.s32 4294967295, %s1954_s14   ;;  %s2024_s16 = sadd.s32 1, %s1954_s14   ;;  %s1954_s14 = sphi %s2013_s14, %s2629_s14   ;;  %s1950_s13 = sphi %s2011_s13, %s2628_s13   ;;  %s1946_s12 = sphi %s2009_s12, %s2627_s12  }
   0x3   : > { %s85_s17 = ssub.s32 %s1954_s14, %s2024_s16  ;;  %s88_s18 = sadd.s32 1, %s1950_s13 }
   0x4   : > { %p86_p0 = scmp.eq.s32.totalorder %s85_s17, 0  ;;  %p98_p1 = scmp.ne.s32.totalorder %s1950_s13, %s1946_s12 }
   0x5   : > { %p99_p2 = scmp.eq.s32.totalorder %s2022_s15, 2  ;;  %p1498_p3 = scmp.ge.s32.totalorder %s1954_s14, 1 }
   0x6   : > { %s2032_s19 = scalar_select %p86_p0, %s1950_s13, %s88_s18  }
   0x7   : > { %p2034_p4 = por %p99_p2, %p98_p1  ;;  %p149_p5 = scmp.lt.s32.totalorder %s1954_s14, 4 }
   0x9   : > { %p150_p6 = pnand %p1498_p3, %p149_p5 }
   0xa   : > { %v204_v0 = vld [vmem:[%s2617_s0 + $0x10] sm:$0xff] (!%p150_p6)  ;;  %v202_v1 = vld [vmem:[%s2617_s0] sm:$0xff] (!%p150_p6)  ;;  %v205_v2 = vld [vmem:[%s2617_s0 + $0x18] sm:$0xff] (!%p150_p6)  ;;  %v1988_v3 = vmov (!%p150_p6), 0   ;;  %s2153_s5 = sshll.u32 (!%p150_p6), %s2022_s15, 4  ;;  %vm1009_vm0 = vcmask (!%p150_p6), 1043456  }
   0xb   : > { %153 = sbr.rel (%p150_p6) target bundleno = 577 (0x241), region = 32  ;;  %1719 = vset.pattern.permute.xlu1 (!%p150_p6), %v1988_v3  ;;  %1718 = vset.pattern.permute.xlu0 (!%p150_p6), %v1988_v3  ;;  %v1504_v4 = vmul.f32 (!%p150_p6), -1.442695, %v204_v0  ;;  %v1502_v5 = vmul.f32 (!%p150_p6), -1.442695, %v202_v1  ;;  %v203_v7 = vld [vmem:[%s2617_s0 + $0x8] sm:$0xff] (!%p150_p6) }
   0xc   : > { %v1505_v6 = vmul.f32 (!%p150_p6), -1.442695, %v205_v2  ;;  %v207_v8 = vld [vmem:[%s2617_s0 + $0x28] sm:$0xff] (!%p150_p6)  ;;  %v206_v9 = vld [vmem:[%s2617_s0 + $0x20] sm:$0xff] (!%p150_p6)  ;;  %1161 = vmatprep.mubr.bf16.mxu0 (!%p150_p6), %v1988_v3  ;;  %v1503_v10 = vmul.f32 (!%p150_p6), -1.442695, %v203_v7 }
   0xd   : > { %1752 = vpow2.f32 (!%p150_p6), %v1504_v4  ;;  %v1507_v11 = vmul.f32 (!%p150_p6), -1.442695, %v207_v8  ;;  %v1506_v12 = vmul.f32 (!%p150_p6), -1.442695, %v206_v9  ;;  %v209_v13 = vld [vmem:[%s2617_s0 + $0x38] sm:$0xff] (!%p150_p6)  ;;  %v208_v14 = vld [vmem:[%s2617_s0 + $0x30] sm:$0xff] (!%p150_p6) }
   0xe   : > { %1754 = vpow2.f32 (!%p150_p6), %v1502_v5  ;;  %v211_v15 = vld [vmem:[%s2617_s0 + $0x48] sm:$0xff] (!%p150_p6)  ;;  %v1509_v16 = vmul.f32 (!%p150_p6), -1.442695, %v209_v13  ;;  %v1508_v17 = vmul.f32 (!%p150_p6), -1.442695, %v208_v14  ;;  %v210_v18 = vld [vmem:[%s2617_s0 + $0x40] sm:$0xff] (!%p150_p6) }
   0xf   : > { %1756 = vpow2.f32 (!%p150_p6), %v1505_v6  ;;  %v213_v19 = vld [vmem:[%s2617_s0 + $0x58] sm:$0xff] (!%p150_p6)  ;;  %v1511_v20 = vmul.f32 (!%p150_p6), -1.442695, %v211_v15  ;;  %v212_v21 = vld [vmem:[%s2617_s0 + $0x50] sm:$0xff] (!%p150_p6)  ;;  %v1510_v22 = vmul.f32 (!%p150_p6), -1.442695, %v210_v18 }
  0x10   : > { %1758 = vpow2.f32 (!%p150_p6), %v1503_v10  ;;  %v215_v23 = vld [vmem:[%s2617_s0 + $0x68] sm:$0xff] (!%p150_p6)  ;;  %v1513_v24 = vmul.f32 (!%p150_p6), -1.442695, %v213_v19  ;;  %v1512_v25 = vmul.f32 (!%p150_p6), -1.442695, %v212_v21  ;;  %v214_v46 = vld [vmem:[%s2617_s0 + $0x60] sm:$0xff] (!%p150_p6) }
  0x11   : > { %1760 = vpow2.f32 (!%p150_p6), %v1507_v11  ;;  %v1515_v26 = vmul.f32 (!%p150_p6), -1.442695, %v215_v23  ;;  %v217_v49 = vld [vmem:[%s2617_s0 + $0x78] sm:$0xff] (!%p150_p6)  ;;  %v216_v52 = vld [vmem:[%s2617_s0 + $0x70] sm:$0xff] (!%p150_p6)  ;;  %v1514_v55 = vmul.f32 (!%p150_p6), -1.442695, %v214_v46 }
  0x12   : > { %1762 = vpow2.f32 %v1506_v12  ;;  %v219_v56 = vld [vmem:[%s2617_s0 + $0x88] sm:$0xff]  ;;  %v1517_v59 = vmul.f32 -1.442695, %v217_v49  ;;  %v218_v60 = vld [vmem:[%s2617_s0 + $0x80] sm:$0xff]  ;;  %v1516_v62 = vmul.f32 -1.442695, %v216_v52 }
  0x13   : > { %1764 = vpow2.f32 %v1509_v16  ;;  %v221_v63 = vld [vmem:[%s2617_s0 + $0x98] sm:$0xff]  ;;  %v1519_v1 = vmul.f32 -1.442695, %v219_v56  ;;  %v220_v2 = vld [vmem:[%s2617_s0 + $0x90] sm:$0xff]  ;;  %v1518_v5 = vmul.f32 -1.442695, %v218_v60 }
  0x14   : > { %1766 = vpow2.f32 %v1508_v17  ;;  %v223_v6 = vld [vmem:[%s2617_s0 + $0xa8] sm:$0xff]  ;;  %v1521_v8 = vmul.f32 -1.442695, %v221_v63  ;;  %v222_v9 = vld [vmem:[%s2617_s0 + $0xa0] sm:$0xff]  ;;  %v1520_v11 = vmul.f32 -1.442695, %v220_v2 }
  0x15   : > { %1768 = vpow2.f32 %v1511_v20  ;;  %v225_v12 = vld [vmem:[%s2617_s0 + $0xb8] sm:$0xff]  ;;  %v1523_v14 = vmul.f32 -1.442695, %v223_v6  ;;  %v224_v15 = vld [vmem:[%s2617_s0 + $0xb0] sm:$0xff]  ;;  %v1522_v17 = vmul.f32 -1.442695, %v222_v9 }
  0x16   : > { %1770 = vpow2.f32 %v1510_v22  ;;  %v1525_v19 = vmul.f32 -1.442695, %v225_v12  ;;  %v1524_v21 = vmul.f32 -1.442695, %v224_v15  ;;  %v236_v6 = vld [vmem:[%s2617_s0 + $0x110] sm:$0xff]  ;;  %p184_p7 = scmp.lt.s32.totalorder %s2153_s5, 36 }
  0x17   : > { %v1753_v27 = vpop.eup %1752  ;;  %1772 = vpow2.f32 %v1513_v24  ;;  %vm984_vm1 = vcmask 326656   ;;  %vm1243_vm2 = vcmask 556032  }
  0x18   : > { %v1755_v28 = vpop.eup %1754  ;;  %v352_v29 = vadd.f32 1.0, %v1753_v27  ;;  %1774 = vpow2.f32 %v1512_v25  ;;  %v227_v25 = vld [vmem:[%s2617_s0 + $0xc8] sm:$0xff]  ;;  %s185_s6 = scalar_select %p184_p7, %s2153_s5, 36 }
  0x19   : > { %v1757_v30 = vpop.eup %1756  ;;  %v350_v31 = vadd.f32 1.0, %v1755_v28  ;;  %1776 = vpow2.f32 %v1515_v26 }
  0x1a   : > { %v1759_v32 = vpop.eup %1758  ;;  %1778 = vrcp.f32 %v352_v29  ;;  %v353_v33 = vadd.f32 1.0, %v1757_v30  ;;  %v226_v29 = vld [vmem:[%s2617_s0 + $0xc0] sm:$0xff]  ;;  %s1628_s7 = smul.u32 12, %s185_s6  ;;  %s175_s6 = sand.u32 1, %s1946_s12  }
  0x1b   : > { %v1761_v34 = vpop.eup %1760  ;;  %1780 = vrcp.f32 %v350_v31  ;;  %v351_v35 = vadd.f32 1.0, %v1759_v32  ;;  %v1527_v32 = vmul.f32 -1.442695, %v227_v25  ;;  %s1283_s12 = ssub.s32 (%p2034_p4), 37, %s2153_s5 }
  0x1c   : > { %v1763_v36 = vpop.eup %1762  ;;  %1782 = vrcp.f32 %v353_v33  ;;  %v355_v37 = vadd.f32 1.0, %v1761_v34  ;;  %s2160_s10 = scalar_lea.vmem %s2619_s2, %s1628_s7  ;;  %s1499_s7 = sshll.u32 %s175_s6, 8 }
  0x1d   : > { %v1765_v38 = vpop.eup %1764  ;;  %1784 = vrcp.f32 %v351_v35  ;;  %v354_v39 = vadd.f32 1.0, %v1763_v36  ;;  %s2424_s8 = scalar_lea.vmem [#allocation2], %s1499_s7   ;;  %p1284_p8 = scmp.lt.s32.totalorder (%p2034_p4), %s1283_s12, 16 }
  0x1e   : > { %v1767_v40 = vpop.eup %1766  ;;  %1786 = vrcp.f32 %v355_v37  ;;  %v357_v41 = vadd.f32 1.0, %v1765_v38  ;;  %v1526_v37 = vmul.f32 -1.442695, %v226_v29 }
  0x1f   : > { %v1769_v42 = vpop.eup %1768  ;;  %1788 = vrcp.f32 %v354_v39  ;;  %v356_v43 = vadd.f32 1.0, %v1767_v40 }
  0x20   : > { %v1771_v44 = vpop.eup %1770  ;;  %1790 = vrcp.f32 %v357_v41  ;;  %v359_v45 = vadd.f32 1.0, %v1769_v42 }
  0x21   : > { %v1773_v47 = vpop.eup %1772  ;;  %1792 = vrcp.f32 %v356_v43  ;;  %v358_v48 = vadd.f32 1.0, %v1771_v44 }
  0x22   : > { %v1775_v50 = vpop.eup %1774  ;;  %1794 = vrcp.f32 %v359_v45  ;;  %v361_v51 = vadd.f32 1.0, %v1773_v47 }
  0x23   : > { %v1777_v53 = vpop.eup %1776  ;;  %1796 = vrcp.f32 %v358_v48  ;;  %v360_v54 = vadd.f32 1.0, %v1775_v50  ;;  %v229_v48 = vld [vmem:[%s2617_s0 + $0xd8] sm:$0xff] }
  0x24   : > { %v1779_v57 = vpop.eup %1778  ;;  %1798 = vrcp.f32 %v361_v51  ;;  %v363_v58 = vadd.f32 1.0, %v1777_v53  ;;  %v228_v51 = vld [vmem:[%s2617_s0 + $0xd0] sm:$0xff]  ;;  %v235_v53 = vld [vmem:[%s2617_s0 + $0x108] sm:$0xff] }
  0x25   : > { %v1781_v61 = vpop.eup %1780  ;;  %547 = vperm.xlu1 %1719, %v1779_v57   ;;  %1800 = vrcp.f32 %v360_v54  ;;  %v1529_v54 = vmul.f32 -1.442695, %v229_v48  ;;  %v1528_v57 = vmul.f32 -1.442695, %v228_v51  ;;  %v1535_v60 = vmul.f32 -1.442695, %v235_v53 }
  0x26   : > { %v1783_v0 = vpop.eup %1782  ;;  %537 = vperm.xlu0 %1718, %v1781_v61   ;;  %1802 = vrcp.f32 %v363_v58  ;;  %v231_v58 = vld [vmem:[%s2617_s0 + $0xe8] sm:$0xff]  ;;  %v230_v61 = vld [vmem:[%s2617_s0 + $0xe0] sm:$0xff] }
  0x27   : > { %v1785_v4 = vpop.eup %1784  ;;  %1804 = vpow2.f32 %v1514_v55  ;;  %v234_v55 = vld [vmem:[%s2617_s0 + $0x100] sm:$0xff]  ;;  %v1531_v2 = vmul.f32 -1.442695, %v231_v58 }
  0x28   : > { %v1787_v7 = vpop.eup %1786  ;;  %1806 = vpow2.f32 %v1517_v59  ;;  %v1534_v63 = vmul.f32 -1.442695, %v234_v55 }
  0x29   : > { %v1789_v10 = vpop.eup %1788  ;;  %552 = vperm.xlu1 %1719, %v1783_v0   ;;  %1808 = vpow2.f32 %v1516_v62  ;;  %v237_v0 = vld [vmem:[%s2617_s0 + $0x118] sm:$0xff] }
  0x2a   : > { %v1791_v13 = vpop.eup %1790  ;;  %542 = vperm.xlu0 %1718, %v1785_v4   ;;  %1810 = vpow2.f32 %v1519_v1 }
  0x2b   : > { %v1793_v16 = vpop.eup %1792  ;;  %1812 = vpow2.f32 %v1518_v5  ;;  %v1530_v5 = vmul.f32 -1.442695, %v230_v61 }
  0x2c   : > { %v1795_v18 = vpop.eup %1794  ;;  %1814 = vpow2.f32 %v1521_v8  ;;  %v1537_v8 = vmul.f32 -1.442695, %v237_v0  ;;  %v461_v0 = vld [vmem:[%s2618_s1] sm:$0xff] }
  0x2d   : > { %v1797_v20 = vpop.eup %1796  ;;  %562 = vperm.xlu1 %1719, %v1787_v7   ;;  %1816 = vpow2.f32 %v1520_v11  ;;  %v233_v11 = vld [vmem:[%s2617_s0 + $0xf8] sm:$0xff] }
  0x2e   : > { %v1799_v22 = vpop.eup %1798  ;;  %557 = vperm.xlu0 %1718, %v1789_v10   ;;  %1818 = vpow2.f32 %v1523_v14 }
  0x2f   : > { %v1801_v23 = vpop.eup %1800  ;;  %1820 = vpow2.f32 %v1522_v17 }
  0x30   : > { %v1803_v24 = vpop.eup %1802  ;;  %1822 = vpow2.f32 %v1525_v19 }
  0x31   : > { %v1805_v26 = vpop.eup %1804  ;;  %572 = vperm.xlu1 %1719, %v1791_v13   ;;  %1824 = vpow2.f32 %v1524_v21  ;;  %v1536_v13 = vmul.f32 -1.442695, %v236_v6 }
  0x32   : > { %v1807_v27 = vpop.eup %1806  ;;  %567 = vperm.xlu0 %1718, %v1793_v16   ;;  %v362_v28 = vadd.f32 1.0, %v1805_v26  ;;  %v232_v16 = vld [vmem:[%s2617_s0 + $0xf0] sm:$0xff] }
  0x33   : > { %v1809_v30 = vpop.eup %1808  ;;  %v365_v31 = vadd.f32 1.0, %v1807_v27  ;;  %v1532_v21 = vmul.f32 -1.442695, %v232_v16  ;;  %v472_v16 = vld [vmem:[%s2618_s1 + $0x58] sm:$0xff] }
  0x34   : > { %v1811_v33 = vpop.eup %1810  ;;  %1826 = vrcp.f32 %v362_v28  ;;  %v364_v34 = vadd.f32 1.0, %v1809_v30 }
  0x35   : > { %v1813_v35 = vpop.eup %1812  ;;  %582 = vperm.xlu1 %1719, %v1795_v18   ;;  %1828 = vrcp.f32 %v365_v31  ;;  %v367_v36 = vadd.f32 1.0, %v1811_v33  ;;  %v1533_v18 = vmul.f32 -1.442695, %v233_v11 }
  0x36   : > { %v1815_v38 = vpop.eup %1814  ;;  %577 = vperm.xlu0 %1718, %v1797_v20   ;;  %1830 = vrcp.f32 %v364_v34  ;;  %v366_v39 = vadd.f32 1.0, %v1813_v35 }
  0x37   : > { %v1817_v40 = vpop.eup %1816  ;;  %v369_v41 = vadd.f32 1.0, %v1815_v38  ;;  %1832 = vpow2.f32 %v1527_v32 }
  0x38   : > { %v1819_v42 = vpop.eup %1818  ;;  %1834 = vrcp.f32 %v367_v36  ;;  %v368_v43 = vadd.f32 1.0, %v1817_v40 }
  0x39   : > { %v1821_v44 = vpop.eup %1820  ;;  %592 = vperm.xlu1 %1719, %v1799_v22   ;;  %v371_v45 = vadd.f32 1.0, %v1819_v42  ;;  %1836 = vpow2.f32 %v1526_v37 }
  0x3a   : > { %v1823_v46 = vpop.eup %1822  ;;  %587 = vperm.xlu0 %1718, %v1801_v23   ;;  %1838 = vrcp.f32 %v366_v39  ;;  %v370_v47 = vadd.f32 1.0, %v1821_v44  ;;  %v238_v23 = vld [vmem:[%s2617_s0 + $0x120] sm:$0xff] }
  0x3b   : > { %v1825_v49 = vpop.eup %1824  ;;  %1840 = vrcp.f32 %v369_v41  ;;  %v373_v50 = vadd.f32 1.0, %v1823_v46  ;;  %v1538_v29 = vmul.f32 -1.442695, %v238_v23 }
  0x3c   : > { %1842 = vrcp.f32 %v368_v43  ;;  %v372_v52 = vadd.f32 1.0, %v1825_v49 }
  0x3d   : > { %602 = vperm.xlu1 %1719, %v1803_v24   ;;  %1844 = vrcp.f32 %v371_v45 }
  0x3e   : > { %v1827_v56 = vpop.eup %1826  ;;  %1846 = vrcp.f32 %v370_v47 }
  0x3f   : > { %v1829_v59 = vpop.eup %1828  ;;  %597 = vperm.xlu0 %1718, %v1827_v56   ;;  %1848 = vrcp.f32 %v373_v50 }
  0x40   : > { %v1831_v62 = vpop.eup %1830  ;;  %1850 = vrcp.f32 %v372_v52 }
  0x41   : > { %v1833_v1 = vpop.eup %1832  ;;  %612 = vperm.xlu1 %1719, %v1829_v59   ;;  %1852 = vpow2.f32 %v1529_v54 }
  0x42   : > { %v1835_v4 = vpop.eup %1834  ;;  %1854 = vpow2.f32 %v1528_v57  ;;  %v375_v10 = vadd.f32 1.0, %v1833_v1  ;;  %v462_v1 = vld [vmem:[%s2618_s1 + $0x8] sm:$0xff] }
  0x43   : > { %v1837_v7 = vpop.eup %1836  ;;  %607 = vperm.xlu0 %1718, %v1831_v62   ;;  %1856 = vpow2.f32 %v1535_v60  ;;  %v1722_v60 = vld [vmem:[%s2160_s10 + $0x4] ss:$12 sps:$4 sm:$0xff]  }
  0x44   : > { %v1839_v9 = vpop.eup %1838  ;;  %1858 = vpow2.f32 %v1534_v63  ;;  %v374_v15 = vadd.f32 1.0, %v1837_v7  ;;  %1048 = vmatprep.mubr.bf16.mxu1 %v1722_v60  ;;  %v466_v63 = vld [vmem:[%s2618_s1 + $0x28] sm:$0xff] }
  0x45   : > { %v1841_v12 = vpop.eup %1840  ;;  %622 = vperm.xlu1 %1719, %v1835_v4   ;;  %1860 = vpow2.f32 %v1531_v2  ;;  %v468_v2 = vld [vmem:[%s2618_s1 + $0x38] sm:$0xff]  ;;  %v463_v4 = vld [vmem:[%s2618_s1 + $0x10] sm:$0xff] }
  0x46   : > { %v1843_v14 = vpop.eup %1842  ;;  %1862 = vpow2.f32 %v1530_v5  ;;  %v464_v5 = vld [vmem:[%s2618_s1 + $0x18] sm:$0xff] }
  0x47   : > { %v1845_v17 = vpop.eup %1844  ;;  %617 = vperm.xlu0 %1718, %v1839_v9   ;;  %1864 = vpow2.f32 %v1537_v8 }
  0x48   : > { %v1847_v19 = vpop.eup %1846  ;;  %1866 = vrcp.f32 %v375_v10  ;;  %v465_v10 = vld [vmem:[%s2618_s1 + $0x20] sm:$0xff] }
  0x49   : > { %v1849_v20 = vpop.eup %1848  ;;  %632 = vperm.xlu1 %1719, %v1841_v12   ;;  %1868 = vpow2.f32 %v1536_v13  ;;  %v467_v12 = vld [vmem:[%s2618_s1 + $0x30] sm:$0xff] }
  0x4a   : > { %v1851_v22 = vpop.eup %1850  ;;  %1870 = vrcp.f32 %v374_v15 }
  0x4b   : > { %v1853_v24 = vpop.eup %1852  ;;  %627 = vperm.xlu0 %1718, %v1843_v14   ;;  %1872 = vpow2.f32 %v1533_v18 }
  0x4c   : > { %v1855_v25 = vpop.eup %1854  ;;  %v377_v26 = vadd.f32 1.0, %v1853_v24  ;;  %1874 = vpow2.f32 %v1532_v21 }
  0x4d   : > { %v1857_v27 = vpop.eup %1856  ;;  %642 = vperm.xlu1 %1719, %v1845_v17   ;;  %v376_v28 = vadd.f32 1.0, %v1855_v25  ;;  %v470_v17 = vld [vmem:[%s2618_s1 + $0x48] sm:$0xff]  ;;  %v471_v25 = vld [vmem:[%s2618_s1 + $0x50] sm:$0xff] }
  0x4e   : > { %v1859_v30 = vpop.eup %1858  ;;  %1876 = vrcp.f32 %v377_v26  ;;  %v383_v31 = vadd.f32 1.0, %v1857_v27  ;;  %v469_v27 = vld [vmem:[%s2618_s1 + $0x40] sm:$0xff] }
  0x4f   : > { %v1861_v32 = vpop.eup %1860  ;;  %637 = vperm.xlu0 %1718, %v1847_v19   ;;  %1878 = vrcp.f32 %v376_v28  ;;  %v382_v33 = vadd.f32 1.0, %v1859_v30  ;;  %v474_v30 = vld [vmem:[%s2618_s1 + $0x68] sm:$0xff] }
  0x50   : > { %v1863_v34 = vpop.eup %1862  ;;  %1880 = vrcp.f32 %v383_v31  ;;  %v379_v35 = vadd.f32 1.0, %v1861_v32 }
  0x51   : > { %v1865_v36 = vpop.eup %1864  ;;  %652 = vperm.xlu1 %1719, %v1849_v20   ;;  %1882 = vpow2.f32 %v1538_v29  ;;  %v378_v38 = vadd.f32 1.0, %v1863_v34  ;;  %v476_v29 = vld [vmem:[%s2618_s1 + $0x78] sm:$0xff] }
  0x52   : > { %v1867_v37 = vpop.eup %1866  ;;  %1884 = vrcp.f32 %v382_v33  ;;  %v385_v41 = vadd.f32 1.0, %v1865_v36 }
  0x53   : > { %v1869_v39 = vpop.eup %1868  ;;  %647 = vperm.xlu0 %1718, %v1851_v22   ;;  %1886 = vrcp.f32 %v379_v35 }
  0x54   : > { %v1871_v40 = vpop.eup %1870  ;;  %1888 = vrcp.f32 %v378_v38  ;;  %v384_v43 = vadd.f32 1.0, %v1869_v39  ;;  %v473_v39 = vld [vmem:[%s2618_s1 + $0x60] sm:$0xff] }
  0x55   : > { %v1873_v42 = vpop.eup %1872  ;;  %662 = vperm.xlu1 %1719, %v1867_v37   ;;  %1890 = vrcp.f32 %v385_v41  ;;  %v475_v37 = vld [vmem:[%s2618_s1 + $0x70] sm:$0xff]  ;;  %v480_v41 = vld [vmem:[%s2618_s1 + $0x98] sm:$0xff] }
  0x56   : > { %v1875_v44 = vpop.eup %1874  ;;  %v381_v46 = vadd.f32 1.0, %v1873_v42  ;;  %1892 = vrcp.f32 %v384_v43  ;;  %v478_v42 = vld [vmem:[%s2618_s1 + $0x88] sm:$0xff] }
  0x57   : > { %657 = vperm.xlu0 %1718, %v1871_v40   ;;  %v380_v49 = vadd.f32 1.0, %v1875_v44 }
  0x58   : > { %v1877_v45 = vpop.eup %1876  ;;  %1894 = vrcp.f32 %v381_v46 }
  0x59   : > { %v1879_v47 = vpop.eup %1878  ;;  %672 = vperm.xlu1 %1719, %v1877_v45   ;;  %1896 = vrcp.f32 %v380_v49  ;;  %v479_v49 = vld [vmem:[%s2618_s1 + $0x90] sm:$0xff] }
  0x5a   : > { %v1881_v48 = vpop.eup %1880 }
  0x5b   : > { %v1883_v50 = vpop.eup %1882  ;;  %667 = vperm.xlu0 %1718, %v1879_v47  }
  0x5c   : > { %v1885_v51 = vpop.eup %1884  ;;  %v386_v53 = vadd.f32 1.0, %v1883_v50 }
  0x5d   : > { %702 = vperm.xlu1 %1719, %v1881_v48   ;;  %v1887_v52 = vpop.eup %1886 }
  0x5e   : > { %v1889_v54 = vpop.eup %1888  ;;  %1898 = vrcp.f32 %v386_v53  ;;  %v484_v53 = vld [vmem:[%s2618_s1 + $0xb8] sm:$0xff] }
  0x5f   : > { %697 = vperm.xlu0 %1718, %v1885_v51   ;;  %v1891_v55 = vpop.eup %1890  ;;  %v477_v51 = vld [vmem:[%s2618_s1 + $0x80] sm:$0xff] }
  0x60   : > { %v1893_v56 = vpop.eup %1892 }
  0x61   : > { %682 = vperm.xlu1 %1719, %v1887_v52  }
  0x62   : > { %v1895_v57 = vpop.eup %1894 }
  0x63   : > { %677 = vperm.xlu0 %1718, %v1889_v54   ;;  %v1897_v58 = vpop.eup %1896  ;;  %v482_v54 = vld [vmem:[%s2618_s1 + $0xa8] sm:$0xff] }
  0x65   : > { %712 = vperm.xlu1 %1719, %v1891_v55  }
  0x67   : > { %707 = vperm.xlu0 %1718, %v1893_v56  }
  0x68   : > { %v1899_v59 = vpop.eup %1898 }
  0x69   : > { %692 = vperm.xlu1 %1719, %v1895_v57  }
  0x6b   : > { %687 = vperm.xlu0 %1718, %v1897_v58  }
  0x6f   : > { %717 = vperm.xlu0 %1718, %v1899_v59  }
  0xa4   : > { %v548_v61 = vpop.permute.xlu1 %547 }
  0xa5   : > { %v538_v62 = vpop.permute.xlu0 %537  ;;  %v725_v7 = vmul.f32 %v548_v61, %v466_v63  ;;  %v724_v21 = vmul.f32 %v548_v61, %v465_v10  ;;  %v483_v61 = vld [vmem:[%s2618_s1 + $0xb0] sm:$0xff]  ;;  %v481_v63 = vld [vmem:[%s2618_s1 + $0xa0] sm:$0xff] }
  0xa6   : > { %v720_v8 = vmul.f32 %v538_v62, %v461_v0  ;;  %v721_v11 = vmul.f32 %v538_v62, %v462_v1  ;;  %v488_v1 = vld [vmem:[%s2618_s1 + $0xd8] sm:$0xff] }
  0xa8   : > { %v553_v6 = vpop.permute.xlu1 %552 }
  0xa9   : > { %v543_v9 = vpop.permute.xlu0 %542  ;;  %v727_v13 = vmul.f32 %v553_v6, %v468_v2  ;;  %v726_v22 = vmul.f32 %v553_v6, %v467_v12 }
  0xaa   : > { %v722_v14 = vmul.f32 %v543_v9, %v463_v4  ;;  %v723_v15 = vmul.f32 %v543_v9, %v464_v5  ;;  %v486_v4 = vld [vmem:[%s2618_s1 + $0xc8] sm:$0xff]  ;;  %v487_v9 = vld [vmem:[%s2618_s1 + $0xd0] sm:$0xff] }
  0xab   : > { %v797_v24 = vpack.c.bf16 %v727_v13, %v725_v7  ;;  %v796_v32 = vpack.c.bf16 %v726_v22, %v724_v21  ;;  %v491_v21 = vld [vmem:[%s2618_s1 + $0xf0] sm:$0xff] }
  0xac   : > { %v563_v18 = vpop.permute.xlu1 %562  ;;  %v795_v19 = vpack.c.bf16 %v723_v15, %v721_v11  ;;  %v794_v20 = vpack.c.bf16 %v722_v14, %v720_v8  ;;  %v485_v11 = vld [vmem:[%s2618_s1 + $0xc0] sm:$0xff]  ;;  %v492_v14 = vld [vmem:[%s2618_s1 + $0xf8] sm:$0xff] }
  0xad   : > { %v558_v23 = vpop.permute.xlu0 %557  ;;  %v731_v26 = vmul.f32 %v563_v18, %v472_v16  ;;  %v730_v33 = vmul.f32 %v563_v18, %v471_v25  ;;  %v490_v16 = vld [vmem:[%s2618_s1 + $0xe8] sm:$0xff] }
  0xae   : > { %v729_v28 = vmul.f32 %v558_v23, %v470_v17  ;;  %1016 = vmatprep.subr.bf16.mxu1 %v795_v19  ;;  %v728_v34 = vmul.f32 %v558_v23, %v469_v27  ;;  %v489_v23 = vld [vmem:[%s2618_s1 + $0xe0] sm:$0xff] }
  0xaf   : > { %1017 = vmatpush1.bf16.msra.mxu1 %v794_v20 }
  0xb0   : > { %1018 = vmatprep.subr.bf16.mxu1 %v797_v24  ;;  %v573_v31 = vpop.permute.xlu1 %572  ;;  %v799_v36 = vpack.c.bf16 %v731_v26, %v729_v28  ;;  %v798_v44 = vpack.c.bf16 %v730_v33, %v728_v34  ;;  %v496_v26 = vld [vmem:[%s2618_s1 + $0x118] sm:$0xff]  ;;  %v494_v28 = vld [vmem:[%s2618_s1 + $0x108] sm:$0xff]  ;;  %v495_v33 = vld [vmem:[%s2618_s1 + $0x110] sm:$0xff] }
  0xb1   : > { %v568_v35 = vpop.permute.xlu0 %567  ;;  %v735_v38 = vmul.f32 %v573_v31, %v476_v29  ;;  %v734_v45 = vmul.f32 %v573_v31, %v475_v37 }
  0xb2   : > { %v733_v40 = vmul.f32 %v568_v35, %v474_v30  ;;  %v732_v46 = vmul.f32 %v568_v35, %v473_v39  ;;  %v493_v35 = vld [vmem:[%s2618_s1 + $0x100] sm:$0xff] }
  0xb3   : > { %1019 = vmatpush1.bf16.msra.mxu1 %v796_v32 }
  0xb4   : > { %1020 = vmatprep.subr.bf16.mxu1 %v799_v36  ;;  %v583_v43 = vpop.permute.xlu1 %582  ;;  %v801_v48 = vpack.c.bf16 %v735_v38, %v733_v40  ;;  %v800_v56 = vpack.c.bf16 %v734_v45, %v732_v46  ;;  %v500_v38 = vld [vmem:[%s2618_s1 + $0x138] sm:$0xff]  ;;  %v498_v40 = vld [vmem:[%s2618_s1 + $0x128] sm:$0xff]  ;;  %v499_v45 = vld [vmem:[%s2618_s1 + $0x130] sm:$0xff] }
  0xb5   : > { %v578_v47 = vpop.permute.xlu0 %577  ;;  %v739_v50 = vmul.f32 %v583_v43, %v480_v41  ;;  %v738_v57 = vmul.f32 %v583_v43, %v479_v49 }
  0xb6   : > { %v737_v52 = vmul.f32 %v578_v47, %v478_v42  ;;  %v736_v58 = vmul.f32 %v578_v47, %v477_v51  ;;  %v497_v47 = vld [vmem:[%s2618_s1 + $0x120] sm:$0xff] }
  0xb7   : > { %1021 = vmatpush1.bf16.msra.mxu1 %v798_v44 }
  0xb8   : > { %1022 = vmatprep.subr.bf16.mxu1 %v801_v48  ;;  %v593_v55 = vpop.permute.xlu1 %592  ;;  %v803_v60 = vpack.c.bf16 %v739_v50, %v737_v52  ;;  %v802_v5 = vpack.c.bf16 %v738_v57, %v736_v58  ;;  %v504_v50 = vld [vmem:[%s2618_s1 + $0x158] sm:$0xff]  ;;  %v502_v52 = vld [vmem:[%s2618_s1 + $0x148] sm:$0xff]  ;;  %v503_v57 = vld [vmem:[%s2618_s1 + $0x150] sm:$0xff] }
  0xb9   : > { %v588_v59 = vpop.permute.xlu0 %587  ;;  %v743_v62 = vmul.f32 %v593_v55, %v484_v53  ;;  %v742_v6 = vmul.f32 %v593_v55, %v483_v61 }
  0xba   : > { %v741_v0 = vmul.f32 %v588_v59, %v482_v54  ;;  %v740_v7 = vmul.f32 %v588_v59, %v481_v63  ;;  %v501_v59 = vld [vmem:[%s2618_s1 + $0x140] sm:$0xff] }
  0xbb   : > { %1023 = vmatpush1.bf16.msra.mxu1 %v800_v56 }
  0xbc   : > { %1024 = vmatprep.subr.bf16.mxu1 %v803_v60  ;;  %v603_v2 = vpop.permute.xlu1 %602  ;;  %v805_v8 = vpack.c.bf16 %v743_v62, %v741_v0  ;;  %v804_v17 = vpack.c.bf16 %v742_v6, %v740_v7  ;;  %v508_v62 = vld [vmem:[%s2618_s1 + $0x178] sm:$0xff]  ;;  %v506_v0 = vld [vmem:[%s2618_s1 + $0x168] sm:$0xff]  ;;  %v507_v6 = vld [vmem:[%s2618_s1 + $0x170] sm:$0xff] }
  0xbd   : > { %v747_v10 = vmul.f32 %v603_v2, %v488_v1  ;;  %v746_v18 = vmul.f32 %v603_v2, %v487_v9 }
  0xbe   : > { %v598_v12 = vpop.permute.xlu0 %597 }
  0xbf   : > { %v745_v13 = vmul.f32 %v598_v12, %v486_v4  ;;  %1025 = vmatpush1.bf16.msra.mxu1 %v802_v5  ;;  %v744_v19 = vmul.f32 %v598_v12, %v485_v11  ;;  %v512_v11 = vld [vmem:[%s2618_s1 + $0x198] sm:$0xff] }
  0xc0   : > { %1026 = vmatprep.subr.bf16.mxu1 %v805_v8  ;;  %v613_v15 = vpop.permute.xlu1 %612  ;;  %v505_v8 = vld [vmem:[%s2618_s1 + $0x160] sm:$0xff] }
  0xc1   : > { %v807_v20 = vpack.c.bf16 %v747_v10, %v745_v13  ;;  %v751_v22 = vmul.f32 %v613_v15, %v492_v14  ;;  %v806_v29 = vpack.c.bf16 %v746_v18, %v744_v19  ;;  %v750_v30 = vmul.f32 %v613_v15, %v491_v21  ;;  %v510_v13 = vld [vmem:[%s2618_s1 + $0x188] sm:$0xff]  ;;  %v511_v18 = vld [vmem:[%s2618_s1 + $0x190] sm:$0xff] }
  0xc2   : > { %v608_v24 = vpop.permute.xlu0 %607 }
  0xc3   : > { %v749_v25 = vmul.f32 %v608_v24, %v490_v16  ;;  %1027 = vmatpush1.bf16.msra.mxu1 %v804_v17  ;;  %v748_v31 = vmul.f32 %v608_v24, %v489_v23  ;;  %v516_v23 = vld [vmem:[%s2618_s1 + $0x1b8] sm:$0xff] }
  0xc4   : > { %1028 = vmatprep.subr.bf16.mxu1 %v807_v20  ;;  %v623_v27 = vpop.permute.xlu1 %622  ;;  %v509_v20 = vld [vmem:[%s2618_s1 + $0x180] sm:$0xff] }
  0xc5   : > { %v809_v32 = vpack.c.bf16 %v751_v22, %v749_v25  ;;  %v755_v34 = vmul.f32 %v623_v27, %v496_v26  ;;  %v808_v41 = vpack.c.bf16 %v750_v30, %v748_v31  ;;  %v754_v42 = vmul.f32 %v623_v27, %v495_v33  ;;  %v514_v25 = vld [vmem:[%s2618_s1 + $0x1a8] sm:$0xff]  ;;  %v513_v30 = vld [vmem:[%s2618_s1 + $0x1a0] sm:$0xff] }
  0xc6   : > { %v618_v36 = vpop.permute.xlu0 %617 }
  0xc7   : > { %v753_v37 = vmul.f32 %v618_v36, %v494_v28  ;;  %1029 = vmatpush1.bf16.msra.mxu1 %v806_v29  ;;  %v752_v43 = vmul.f32 %v618_v36, %v493_v35  ;;  %v515_v29 = vld [vmem:[%s2618_s1 + $0x1b0] sm:$0xff]  ;;  %v528_v35 = vld [vmem:[%s2618_s1 + $0x218] sm:$0xff] }
  0xc8   : > { %1030 = vmatprep.subr.bf16.mxu1 %v809_v32  ;;  %v633_v39 = vpop.permute.xlu1 %632 }
  0xc9   : > { %v811_v44 = vpack.c.bf16 %v755_v34, %v753_v37  ;;  %v759_v46 = vmul.f32 %v633_v39, %v500_v38  ;;  %v810_v53 = vpack.c.bf16 %v754_v42, %v752_v43  ;;  %v758_v54 = vmul.f32 %v633_v39, %v499_v45  ;;  %v527_v34 = vld [vmem:[%s2618_s1 + $0x210] sm:$0xff] }
  0xca   : > { %v628_v48 = vpop.permute.xlu0 %627 }
  0xcb   : > { %v757_v49 = vmul.f32 %v628_v48, %v498_v40  ;;  %1031 = vmatpush1.bf16.msra.mxu1 %v808_v41  ;;  %v756_v55 = vmul.f32 %v628_v48, %v497_v47  ;;  %v525_v40 = vld [vmem:[%s2618_s1 + $0x200] sm:$0xff]  ;;  %v526_v41 = vld [vmem:[%s2618_s1 + $0x208] sm:$0xff]  ;;  %v519_v47 = vld [vmem:[%s2618_s1 + $0x1d0] sm:$0xff] }
  0xcc   : > { %1032 = vmatprep.subr.bf16.mxu1 %v811_v44  ;;  %v643_v51 = vpop.permute.xlu1 %642  ;;  %v520_v48 = vld [vmem:[%s2618_s1 + $0x1d8] sm:$0xff] }
  0xcd   : > { %v813_v56 = vpack.c.bf16 %v759_v46, %v757_v49  ;;  %v763_v58 = vmul.f32 %v643_v51, %v504_v50  ;;  %v812_v1 = vpack.c.bf16 %v758_v54, %v756_v55  ;;  %v762_v2 = vmul.f32 %v643_v51, %v503_v57  ;;  %v518_v54 = vld [vmem:[%s2618_s1 + $0x1c8] sm:$0xff] }
  0xce   : > { %v638_v60 = vpop.permute.xlu0 %637 }
  0xcf   : > { %v761_v61 = vmul.f32 %v638_v60, %v502_v52  ;;  %1033 = vmatpush1.bf16.msra.mxu1 %v810_v53  ;;  %v760_v4 = vmul.f32 %v638_v60, %v501_v59  ;;  %v517_v53 = vld [vmem:[%s2618_s1 + $0x1c0] sm:$0xff]  ;;  %v531_v60 = vld [vmem:[%s2618_s1 + $0x230] sm:$0xff] }
  0xd0   : > { %1034 = vmatprep.subr.bf16.mxu1 %v813_v56  ;;  %v653_v63 = vpop.permute.xlu1 %652 }
  0xd1   : > { %v815_v5 = vpack.c.bf16 %v763_v58, %v761_v61  ;;  %v767_v7 = vmul.f32 %v653_v63, %v508_v62  ;;  %v814_v14 = vpack.c.bf16 %v762_v2, %v760_v4  ;;  %v766_v15 = vmul.f32 %v653_v63, %v507_v6  ;;  %v532_v61 = vld [vmem:[%s2618_s1 + $0x238] sm:$0xff]  ;;  %v530_v2 = vld [vmem:[%s2618_s1 + $0x228] sm:$0xff] }
  0xd2   : > { %v648_v9 = vpop.permute.xlu0 %647 }
  0xd3   : > { %v765_v10 = vmul.f32 %v648_v9, %v506_v0  ;;  %1035 = vmatpush1.bf16.msra.mxu1 %v812_v1  ;;  %v764_v16 = vmul.f32 %v648_v9, %v505_v8  ;;  %v529_v1 = vld [vmem:[%s2618_s1 + $0x220] sm:$0xff]  ;;  %v523_v9 = vld [vmem:[%s2618_s1 + $0x1f0] sm:$0xff] }
  0xd4   : > { %1036 = vmatprep.subr.bf16.mxu1 %v815_v5  ;;  %v663_v12 = vpop.permute.xlu1 %662 }
  0xd5   : > { %v817_v17 = vpack.c.bf16 %v767_v7, %v765_v10  ;;  %v771_v19 = vmul.f32 %v663_v12, %v512_v11  ;;  %v816_v26 = vpack.c.bf16 %v766_v15, %v764_v16  ;;  %v770_v27 = vmul.f32 %v663_v12, %v511_v18  ;;  %v524_v10 = vld [vmem:[%s2618_s1 + $0x1f8] sm:$0xff]  ;;  %v522_v15 = vld [vmem:[%s2618_s1 + $0x1e8] sm:$0xff] }
  0xd6   : > { %v658_v21 = vpop.permute.xlu0 %657 }
  0xd7   : > { %v769_v22 = vmul.f32 %v658_v21, %v510_v13  ;;  %1037 = vmatpush1.bf16.msra.mxu1 %v814_v14  ;;  %v768_v28 = vmul.f32 %v658_v21, %v509_v20  ;;  %v521_v14 = vld [vmem:[%s2618_s1 + $0x1e0] sm:$0xff] }
  0xd8   : > { %1038 = vmatprep.subr.bf16.mxu1 %v817_v17  ;;  %v673_v24 = vpop.permute.xlu1 %672 }
  0xd9   : > { %v819_v31 = vpack.c.bf16 %v771_v19, %v769_v22  ;;  %v775_v32 = vmul.f32 %v673_v24, %v516_v23  ;;  %v774_v37 = vmul.f32 %v673_v24, %v515_v29  ;;  %v818_v42 = vpack.c.bf16 %v770_v27, %v768_v28  ;;  %v533_v23 = vld [vmem:[%s2618_s1 + $0x240] sm:$0xff]  ;;  %v534_v24 = vld [vmem:[%s2618_s1 + $0x248] sm:$0xff] }
  0xda   : > { %v668_v33 = vpop.permute.xlu0 %667 }
  0xdb   : > { %v773_v36 = vmul.f32 %v668_v33, %v514_v25  ;;  %1039 = vmatpush1.bf16.msra.mxu1 %v816_v26  ;;  %v772_v38 = vmul.f32 %v668_v33, %v513_v30  ;;  %v1720_v30 = vld [vmem:[%s2160_s10] ss:$12 sps:$4 sm:$0xff]  }
  0xdc   : > { %1040 = vmatprep.subr.bf16.mxu1 %v819_v31  ;;  %v703_v39 = vpop.permute.xlu1 %702  ;;  %v1724_v31 = vld [vmem:[%s2160_s10 + $0x1c] ss:$12 sps:$4 sm:$0xff]  }
  0xdd   : > { %v786_v43 = vmul.f32 %v703_v39, %v527_v34  ;;  %v787_v44 = vmul.f32 %v703_v39, %v528_v35  ;;  %v821_v45 = vpack.c.bf16 %v775_v32, %v773_v36  ;;  %v820_v51 = vpack.c.bf16 %v774_v37, %v772_v38  ;;  %v1723_v35 = vld [vmem:[%s2160_s10 + $0x8] ss:$12 sps:$4 sm:$0xff]   ;;  %v1726_v36 = vld [vmem:[%s2160_s10 + $0x18] ss:$12 sps:$4 sm:$0xff]   ;;  %v1727_v38 = vld [vmem:[%s2160_s10 + $0x20] ss:$12 sps:$4 sm:$0xff]  }
  0xde   : > { %v698_v46 = vpop.permute.xlu0 %697  ;;  %v1728_v37 = vld [vmem:[%s2160_s10 + $0x34] ss:$12 sps:$4 sm:$0xff]   ;;  %v1730_v39 = vld [vmem:[%s2160_s10 + $0x30] ss:$12 sps:$4 sm:$0xff]  }
  0xdf   : > { %v784_v49 = vmul.f32 %v698_v46, %v525_v40  ;;  %v785_v50 = vmul.f32 %v698_v46, %v526_v41  ;;  %1041 = vmatpush1.bf16.msra.mxu1 %v818_v42  ;;  %v1732_v40 = vld [vmem:[%s2160_s10 + $0x4c] ss:$12 sps:$4 sm:$0xff]   ;;  %v1734_v42 = vld [vmem:[%s2160_s10 + $0x48] ss:$12 sps:$4 sm:$0xff]  }
  0xe0   : > { %1042 = vmatprep.subr.bf16.mxu1 %v821_v45  ;;  %v683_v52 = vpop.permute.xlu1 %682  ;;  %v1731_v41 = vld [vmem:[%s2160_s10 + $0x38] ss:$12 sps:$4 sm:$0xff]   ;;  %v1738_v45 = vld [vmem:[%s2160_s10 + $0x60] ss:$12 sps:$4 sm:$0xff]   ;;  %v1740_v46 = vld [vmem:[%s2160_s10 + $0x7c] ss:$12 sps:$4 sm:$0xff]  }
  0xe1   : > { %v778_v55 = vmul.f32 %v683_v52, %v519_v47  ;;  %v779_v56 = vmul.f32 %v683_v52, %v520_v48  ;;  %v827_v57 = vpack.c.bf16 %v787_v44, %v785_v50  ;;  %v826_v58 = vpack.c.bf16 %v786_v43, %v784_v49  ;;  %v1736_v43 = vld [vmem:[%s2160_s10 + $0x64] ss:$12 sps:$4 sm:$0xff]   ;;  %v1739_v47 = vld [vmem:[%s2160_s10 + $0x68] ss:$12 sps:$4 sm:$0xff]   ;;  %v1743_v50 = vld [vmem:[%s2160_s10 + $0x80] ss:$12 sps:$4 sm:$0xff]  }
  0xe2   : > { %v678_v59 = vpop.permute.xlu0 %677  ;;  %v1735_v44 = vld [vmem:[%s2160_s10 + $0x50] ss:$12 sps:$4 sm:$0xff]   ;;  %v1742_v48 = vld [vmem:[%s2160_s10 + $0x78] ss:$12 sps:$4 sm:$0xff]   ;;  %v1744_v49 = vld [vmem:[%s2160_s10 + $0x94] ss:$12 sps:$4 sm:$0xff]  }
  0xe3   : > { %v776_v62 = vmul.f32 %v678_v59, %v517_v53  ;;  %v777_v63 = vmul.f32 %v678_v59, %v518_v54  ;;  %1129 = vmatprep.subr.bf16.mxu0 %v827_v57  ;;  %1043 = vmatpush1.bf16.msra.mxu1 %v820_v51  ;;  %v1746_v51 = vld [vmem:[%s2160_s10 + $0x90] ss:$12 sps:$4 sm:$0xff]   ;;  %v1748_v52 = vld [vmem:[%s2160_s10 + $0xac] ss:$12 sps:$4 sm:$0xff]   ;;  %v1750_v54 = vld [vmem:[%s2160_s10 + $0xa8] ss:$12 sps:$4 sm:$0xff]  }
  0xe4   : > { %1130 = vmatpush1.bf16.msra.mxu0 %v826_v58  ;;  %v713_v0 = vpop.permute.xlu1 %712  ;;  %v1747_v53 = vld [vmem:[%s2160_s10 + $0x98] ss:$12 sps:$4 sm:$0xff]  }
  0xe5   : > { %v822_v4 = vpack.c.bf16 %v778_v55, %v776_v62  ;;  %v823_v5 = vpack.c.bf16 %v779_v56, %v777_v63  ;;  %v790_v6 = vmul.f32 %v713_v0, %v531_v60  ;;  %v791_v7 = vmul.f32 %v713_v0, %v532_v61  ;;  %v1751_v55 = vld [vmem:[%s2160_s10 + $0xb0] ss:$12 sps:$4 sm:$0xff]   ;;  %s1593_s10 = sshll.u32 (%p2034_p4), %s2022_s15, 8 }
  0xe6   : > { %v708_v8 = vpop.permute.xlu0 %707  ;;  %s2481_s14 = scalar_lea.vmem (%p2034_p4), %s2620_s3, %s1593_s10  }
  0xe7   : > { %v788_v11 = vmul.f32 %v708_v8, %v529_v1  ;;  %v789_v12 = vmul.f32 %v708_v8, %v530_v2  ;;  %1044 = vmatprep.subr.bf16.mxu1 %v823_v5 }
  0xe8   : > { %1045 = vmatpush1.bf16.msra.mxu1 %v822_v4  ;;  %v693_v13 = vpop.permute.xlu1 %692 }
  0xe9   : > { %v828_v16 = vpack.c.bf16 %v790_v6, %v788_v11  ;;  %v829_v17 = vpack.c.bf16 %v791_v7, %v789_v12  ;;  %v782_v18 = vmul.f32 %v693_v13, %v523_v9  ;;  %v783_v19 = vmul.f32 %v693_v13, %v524_v10 }
  0xea   : > { %v688_v20 = vpop.permute.xlu0 %687 }
  0xeb   : > { %v780_v21 = vmul.f32 %v688_v20, %v521_v14  ;;  %v781_v22 = vmul.f32 %v688_v20, %v522_v15  ;;  %1131 = vmatprep.subr.bf16.mxu0 %v829_v17 }
  0xec   : > { %1132 = vmatpush1.bf16.msra.mxu0 %v828_v16 }
  0xed   : > { %v824_v25 = vpack.c.bf16 %v782_v18, %v780_v21  ;;  %v825_v26 = vpack.c.bf16 %v783_v19, %v781_v22 }
  0xee   : > { %v718_v27 = vpop.permute.xlu0 %717 }
  0xef   : > { %v792_v28 = vmul.f32 %v718_v27, %v533_v23  ;;  %v793_v29 = vmul.f32 %v718_v27, %v534_v24  ;;  %1046 = vmatprep.subr.bf16.mxu1 %v825_v26 }
  0xf0   : > { %1047 = vmatpush1.bf16.msra.mxu1 %v824_v25 }
  0xf1   : > { %v830_v32 = vpack.c.bf16 %v792_v28, %v792_v28  ;;  %v831_v33 = vpack.c.bf16 %v793_v29, %v793_v29 }
  0xf3   : > { %1563 = vmatprep.subr.msk.bf16.mxu0 %vm1009_vm0, %v831_v33  ;;  %1049 = vmatmul.mubr.bf16.vlgmr.msra.gmra.mrb[0].mxu1 %v1720_v30  ;;  %v1011_v34 = vsel %vm1009_vm0, %v830_v32, 0 }
  0xf4   : > { %1134 = vmatpush1.bf16.msra.mxu0 %v1011_v34  ;;  %1058 = vmatprep.mubr.bf16.mxu1 %v1724_v31 }
  0xf7   : > { %1564 = vmatmul.mubr.msk.bf16.vlgmr.msra.gmra.mrb[0].mxu0 %vm984_vm1, %v1723_v35 }
  0xf8   : > { %1171 = vmatprep.mubr.bf16.mxu0 %v1988_v3 }
  0xfb   : > { %1059 = vmatmul.mubr.bf16.gmra.mrb[4].mxu1 %v1726_v36 }
  0xfc   : > { %1068 = vmatprep.mubr.bf16.mxu1 %v1728_v37 }
  0xff   : > { %1565 = vmatmul.mubr.msk.bf16.gmra.mrb[4].mxu0 %vm984_vm1, %v1727_v38 }
 0x100   : > { %1181 = vmatprep.mubr.bf16.mxu0 %v1988_v3 }
 0x103   : > { %1069 = vmatmul.mubr.bf16.gmra.mrb[8].mxu1 %v1730_v39 }
 0x104   : > { %1078 = vmatprep.mubr.bf16.mxu1 %v1732_v40 }
 0x107   : > { %1566 = vmatmul.mubr.msk.bf16.gmra.mrb[8].mxu0 %vm984_vm1, %v1731_v41 }
 0x108   : > { %1191 = vmatprep.mubr.bf16.mxu0 %v1988_v3 }
 0x10b   : > { %1079 = vmatmul.mubr.bf16.gmra.mrb[12].mxu1 %v1734_v42 }
 0x10c   : > { %1088 = vmatprep.mubr.bf16.mxu1 %v1736_v43 }
 0x10f   : > { %1567 = vmatmul.mubr.msk.bf16.gmra.mrb[12].mxu0 %vm984_vm1, %v1735_v44 }
 0x110   : > { %1201 = vmatprep.mubr.bf16.mxu0 %v1988_v3 }
 0x113   : > { %1089 = vmatmul.mubr.bf16.gmra.mrb[16].mxu1 %v1738_v45 }
 0x114   : > { %1098 = vmatprep.mubr.bf16.mxu1 %v1740_v46 }
 0x117   : > { %1568 = vmatmul.mubr.msk.bf16.gmra.mrb[16].mxu0 %vm984_vm1, %v1739_v47 }
 0x118   : > { %1211 = vmatprep.mubr.bf16.mxu0 %v1988_v3 }
 0x11b   : > { %1099 = vmatmul.mubr.bf16.gmra.mrb[20].mxu1 %v1742_v48 }
 0x11c   : > { %1108 = vmatprep.mubr.bf16.mxu1 %v1744_v49 }
 0x11f   : > { %1569 = vmatmul.mubr.msk.bf16.gmra.mrb[20].mxu0 %vm984_vm1, %v1743_v50 }
 0x120   : > { %1221 = vmatprep.mubr.bf16.mxu0 %v1988_v3 }
 0x123   : > { %1109 = vmatmul.mubr.bf16.gmra.mrb[24].mxu1 %v1746_v51 }
 0x124   : > { %1118 = vmatprep.mubr.bf16.mxu1 %v1748_v52 }
 0x127   : > { %1570 = vmatmul.mubr.msk.bf16.gmra.mrb[24].mxu0 %vm984_vm1, %v1747_v53 }
 0x128   : > { %1231 = vmatprep.mubr.bf16.mxu0 %v1988_v3 }
 0x12b   : > { %1119 = vmatmul.mubr.bf16.gmra.mrb[28].mxu1 %v1750_v54 }
 0x12f   : > { %1571 = vmatmul.mubr.msk.bf16.gmra.mrb[28].mxu0 %vm984_vm1, %v1751_v55 }
 0x1c6   : > { %v1050_v56 = vpop.f32.mrb[0].mxu1 }
 0x1c7   : > { %v1052_v57 = vpop.f32.mrb[1].mxu1 }
 0x1c8   : > { %v1054_v58 = vpop.f32.mrb[2].mxu1 }
 0x1c9   : > { %v1056_v59 = vpop.f32.mrb[3].mxu1 }
 0x1ca   : > { %v1163_v60 = vpop.f32.mrb[0].mxu0 }
 0x1cb   : > { %v1164_v61 = vadd.f32 %v1163_v60, %v1050_v56  ;;  %v1165_v62 = vpop.f32.mrb[1].mxu0 }
 0x1cc   : > { %v1166_v63 = vadd.f32 %v1165_v62, %v1052_v57  ;;  %v1167_v0 = vpop.f32.mrb[2].mxu0 }
 0x1cd   : > { %1242 = vst [vmem:[%s2424_s8] sm:$0xff] %v1164_v61  ;;  %v1168_v3 = vadd.f32 %v1167_v0, %v1054_v58  ;;  %v1169_v1 = vpop.f32.mrb[3].mxu0 }
 0x1ce   : > { %1244 = vst.msk [vmem:[%s2424_s8 + $0x8] sm:$0xff] %vm1243_vm2, %v1166_v63  ;;  %v1170_v2 = vadd.f32 %v1169_v1, %v1056_v59  ;;  %v1060_v4 = vpop.f32.mrb[4].mxu1 }
 0x1cf   : > { %1245 = vst [vmem:[%s2424_s8 + $0x10] sm:$0xff] %v1168_v3  ;;  %v1062_v5 = vpop.f32.mrb[5].mxu1 }
 0x1d0   : > { %1246 = vst.msk [vmem:[%s2424_s8 + $0x18] sm:$0xff] %vm1243_vm2, %v1170_v2  ;;  %v1064_v6 = vpop.f32.mrb[6].mxu1 }
 0x1d1   : > { %v1066_v7 = vpop.f32.mrb[7].mxu1 }
 0x1d2   : > { %v1173_v8 = vpop.f32.mrb[4].mxu0 }
 0x1d3   : > { %v1174_v9 = vadd.f32 %v1173_v8, %v1060_v4  ;;  %v1175_v10 = vpop.f32.mrb[5].mxu0 }
 0x1d4   : > { %v1176_v11 = vadd.f32 %v1175_v10, %v1062_v5  ;;  %v1177_v12 = vpop.f32.mrb[6].mxu0 }
 0x1d5   : > { %1247 = vst [vmem:[%s2424_s8 + $0x20] sm:$0xff] %v1174_v9  ;;  %v1178_v13 = vadd.f32 %v1177_v12, %v1064_v6  ;;  %v1179_v14 = vpop.f32.mrb[7].mxu0 }
 0x1d6   : > { %1248 = vst.msk [vmem:[%s2424_s8 + $0x28] sm:$0xff] %vm1243_vm2, %v1176_v11  ;;  %v1180_v15 = vadd.f32 %v1179_v14, %v1066_v7  ;;  %v1070_v16 = vpop.f32.mrb[8].mxu1 }
 0x1d7   : > { %1249 = vst [vmem:[%s2424_s8 + $0x30] sm:$0xff] %v1178_v13  ;;  %v1072_v17 = vpop.f32.mrb[9].mxu1 }
 0x1d8   : > { %1250 = vst.msk [vmem:[%s2424_s8 + $0x38] sm:$0xff] %vm1243_vm2, %v1180_v15  ;;  %v1074_v18 = vpop.f32.mrb[10].mxu1 }
 0x1d9   : > { %v1076_v19 = vpop.f32.mrb[11].mxu1 }
 0x1da   : > { %v1183_v20 = vpop.f32.mrb[8].mxu0 }
 0x1db   : > { %v1184_v21 = vadd.f32 %v1183_v20, %v1070_v16  ;;  %v1185_v22 = vpop.f32.mrb[9].mxu0 }
 0x1dc   : > { %v1186_v23 = vadd.f32 %v1185_v22, %v1072_v17  ;;  %v1187_v24 = vpop.f32.mrb[10].mxu0 }
 0x1dd   : > { %1251 = vst [vmem:[%s2424_s8 + $0x40] sm:$0xff] %v1184_v21  ;;  %v1188_v25 = vadd.f32 %v1187_v24, %v1074_v18  ;;  %v1189_v26 = vpop.f32.mrb[11].mxu0 }
 0x1de   : > { %1252 = vst.msk [vmem:[%s2424_s8 + $0x48] sm:$0xff] %vm1243_vm2, %v1186_v23  ;;  %v1190_v27 = vadd.f32 %v1189_v26, %v1076_v19  ;;  %v1080_v28 = vpop.f32.mrb[12].mxu1 }
 0x1df   : > { %1253 = vst [vmem:[%s2424_s8 + $0x50] sm:$0xff] %v1188_v25  ;;  %v1082_v29 = vpop.f32.mrb[13].mxu1 }
 0x1e0   : > { %1254 = vst.msk [vmem:[%s2424_s8 + $0x58] sm:$0xff] %vm1243_vm2, %v1190_v27  ;;  %v1084_v30 = vpop.f32.mrb[14].mxu1 }
 0x1e1   : > { %v1086_v31 = vpop.f32.mrb[15].mxu1 }
 0x1e2   : > { %v1193_v32 = vpop.f32.mrb[12].mxu0 }
 0x1e3   : > { %v1194_v33 = vadd.f32 %v1193_v32, %v1080_v28  ;;  %v1195_v34 = vpop.f32.mrb[13].mxu0 }
 0x1e4   : > { %v1196_v35 = vadd.f32 %v1195_v34, %v1082_v29  ;;  %v1197_v36 = vpop.f32.mrb[14].mxu0 }
 0x1e5   : > { %1255 = vst [vmem:[%s2424_s8 + $0x60] sm:$0xff] %v1194_v33  ;;  %v1198_v37 = vadd.f32 %v1197_v36, %v1084_v30  ;;  %v1199_v38 = vpop.f32.mrb[15].mxu0 }
 0x1e6   : > { %1256 = vst.msk [vmem:[%s2424_s8 + $0x68] sm:$0xff] %vm1243_vm2, %v1196_v35  ;;  %v1200_v39 = vadd.f32 %v1199_v38, %v1086_v31  ;;  %v1090_v40 = vpop.f32.mrb[16].mxu1 }
 0x1e7   : > { %1257 = vst [vmem:[%s2424_s8 + $0x70] sm:$0xff] %v1198_v37  ;;  %v1092_v41 = vpop.f32.mrb[17].mxu1 }
 0x1e8   : > { %1258 = vst.msk [vmem:[%s2424_s8 + $0x78] sm:$0xff] %vm1243_vm2, %v1200_v39  ;;  %v1094_v42 = vpop.f32.mrb[18].mxu1 }
 0x1e9   : > { %v1096_v43 = vpop.f32.mrb[19].mxu1 }
 0x1ea   : > { %v1203_v44 = vpop.f32.mrb[16].mxu0 }
 0x1eb   : > { %v1204_v45 = vadd.f32 %v1203_v44, %v1090_v40  ;;  %v1205_v46 = vpop.f32.mrb[17].mxu0 }
 0x1ec   : > { %v1206_v47 = vadd.f32 %v1205_v46, %v1092_v41  ;;  %v1207_v48 = vpop.f32.mrb[18].mxu0 }
 0x1ed   : > { %1259 = vst [vmem:[%s2424_s8 + $0x80] sm:$0xff] %v1204_v45  ;;  %v1208_v49 = vadd.f32 %v1207_v48, %v1094_v42  ;;  %v1209_v50 = vpop.f32.mrb[19].mxu0 }
 0x1ee   : > { %1260 = vst.msk [vmem:[%s2424_s8 + $0x88] sm:$0xff] %vm1243_vm2, %v1206_v47  ;;  %v1210_v51 = vadd.f32 %v1209_v50, %v1096_v43  ;;  %v1100_v52 = vpop.f32.mrb[20].mxu1 }
 0x1ef   : > { %1261 = vst [vmem:[%s2424_s8 + $0x90] sm:$0xff] %v1208_v49  ;;  %v1102_v53 = vpop.f32.mrb[21].mxu1 }
 0x1f0   : > { %1262 = vst.msk [vmem:[%s2424_s8 + $0x98] sm:$0xff] %vm1243_vm2, %v1210_v51  ;;  %v1104_v54 = vpop.f32.mrb[22].mxu1 }
 0x1f1   : > { %v1106_v55 = vpop.f32.mrb[23].mxu1 }
 0x1f2   : > { %v1213_v56 = vpop.f32.mrb[20].mxu0 }
 0x1f3   : > { %v1214_v57 = vadd.f32 %v1213_v56, %v1100_v52  ;;  %v1215_v58 = vpop.f32.mrb[21].mxu0 }
 0x1f4   : > { %v1216_v59 = vadd.f32 %v1215_v58, %v1102_v53  ;;  %v1217_v60 = vpop.f32.mrb[22].mxu0 }
 0x1f5   : > { %1263 = vst [vmem:[%s2424_s8 + $0xa0] sm:$0xff] %v1214_v57  ;;  %v1218_v61 = vadd.f32 %v1217_v60, %v1104_v54  ;;  %v1219_v62 = vpop.f32.mrb[23].mxu0 }
 0x1f6   : > { %1264 = vst.msk [vmem:[%s2424_s8 + $0xa8] sm:$0xff] %vm1243_vm2, %v1216_v59  ;;  %v1220_v63 = vadd.f32 %v1219_v62, %v1106_v55  ;;  %v1110_v0 = vpop.f32.mrb[24].mxu1 }
 0x1f7   : > { %1265 = vst [vmem:[%s2424_s8 + $0xb0] sm:$0xff] %v1218_v61  ;;  %v1112_v3 = vpop.f32.mrb[25].mxu1 }
 0x1f8   : > { %1266 = vst.msk [vmem:[%s2424_s8 + $0xb8] sm:$0xff] %vm1243_vm2, %v1220_v63  ;;  %v1114_v1 = vpop.f32.mrb[26].mxu1 }
 0x1f9   : > { %v1116_v2 = vpop.f32.mrb[27].mxu1 }
 0x1fa   : > { %v1223_v4 = vpop.f32.mrb[24].mxu0 }
 0x1fb   : > { %v1224_v5 = vadd.f32 %v1223_v4, %v1110_v0  ;;  %v1225_v6 = vpop.f32.mrb[25].mxu0 }
 0x1fc   : > { %v1226_v7 = vadd.f32 %v1225_v6, %v1112_v3  ;;  %v1227_v8 = vpop.f32.mrb[26].mxu0 }
 0x1fd   : > { %1267 = vst [vmem:[%s2424_s8 + $0xc0] sm:$0xff] %v1224_v5  ;;  %v1228_v9 = vadd.f32 %v1227_v8, %v1114_v1  ;;  %v1229_v10 = vpop.f32.mrb[27].mxu0 }
 0x1fe   : > { %1268 = vst.msk [vmem:[%s2424_s8 + $0xc8] sm:$0xff] %vm1243_vm2, %v1226_v7  ;;  %v1230_v11 = vadd.f32 %v1229_v10, %v1116_v2  ;;  %v1120_v12 = vpop.f32.mrb[28].mxu1 }
 0x1ff   : > { %1269 = vst [vmem:[%s2424_s8 + $0xd0] sm:$0xff] %v1228_v9  ;;  %v1122_v13 = vpop.f32.mrb[29].mxu1 }
 0x200   : > { %1270 = vst.msk [vmem:[%s2424_s8 + $0xd8] sm:$0xff] %vm1243_vm2, %v1230_v11  ;;  %v1124_v14 = vpop.f32.mrb[30].mxu1 }
 0x201   : > { %v1126_v15 = vpop.f32.mrb[31].mxu1 }
 0x202   : > { %v1233_v16 = vpop.f32.mrb[28].mxu0  ;;  %1281 = sbr.rel (!%p2034_p4) target bundleno = 577 (0x241), region = 36 }
 0x203   : > { %v1234_v17 = vadd.f32 %v1233_v16, %v1120_v12  ;;  %v1235_v18 = vpop.f32.mrb[29].mxu0 }
 0x204   : > { %v1236_v19 = vadd.f32 %v1235_v18, %v1122_v13  ;;  %v1237_v20 = vpop.f32.mrb[30].mxu0 }
 0x205   : > { %1271 = vst [vmem:[%s2424_s8 + $0xe0] sm:$0xff] %v1234_v17  ;;  %v1238_v21 = vadd.f32 %v1237_v20, %v1124_v14  ;;  %v1239_v22 = vpop.f32.mrb[31].mxu0 }
 0x206   : > { %1272 = vst.msk [vmem:[%s2424_s8 + $0xe8] sm:$0xff] %vm1243_vm2, %v1236_v19  ;;  %v1240_v23 = vadd.f32 %v1239_v22, %v1126_v15 }
 0x207   : > { %1273 = vst [vmem:[%s2424_s8 + $0xf0] sm:$0xff] %v1238_v21 }
 0x208   : > { %1274 = vst.msk [vmem:[%s2424_s8 + $0xf8] sm:$0xff] %vm1243_vm2, %v1240_v23 }
 0x209   : > { %s2631_s12 = smov (!%p1284_p8, %s1283_s12), 16 }
 0x20a   : > { %s1591_s17 = sshll.u32 %s2631_s12, 8 }
 0x20b   : > { %p1579_p9 = scmp.eq.s32.totalorder %s1591_s17, 0 }
 0x20c   : > { %s2487_s18 = sshrl.u32 (!%p1579_p9), %s2631_s12, 4 }
 0x20d   : > { %1294 = sbr.rel (%p1579_p9) target bundleno = 577 (0x241), region = 40  ;;  %p1580_p10 = scmp.le.s32.totalorder (!%p1579_p9), %s2487_s18, 0 }
 0x214   : > { %1451 = sbr.rel (%p1580_p10) target bundleno = 556 (0x22c), region = 88  ;;  %s2622_s15 = smov (!%p1580_p10), %s2481_s14 }
 0x215   : > { %s2623_s20 = smov (!%p1580_p10), %s2424_s8  ;;  %s2496_s5 = smov (!%p1580_p10), 0  }
 0x216   : > { %s2498_s21 = smov (!%p1580_p10), 0  }
 0x21b LB: >> { %v1307_v24 = vld [vmem:[%s1962_s20] sm:$0xff]  ;;  %v1309_v25 = vld [vmem:[%s1962_s20 + $0x10] sm:$0xff]  ;;  %s1371_s22 = sadd.s32 1, %s1966_s5  ;;  %v1339_v40 = vld [vmem:[%s1962_s20 + $0x8] sm:$0xff]  ;;  %s1301_s21 = sadd.s32 1, %s1970_s21   ;;  %s1970_s21 = sphi %s2498_s21, %s1301_s21   ;;  %s1966_s5 = sphi %s2496_s5, %s2626_s5   ;;  %s1962_s20 = sphi %s2623_s20, %s2625_s20   ;;  %s1958_s15 = sphi %s2622_s15, %s2624_s15  }
 0x21c   : >> { %v1311_v26 = vld [vmem:[%s1962_s20 + $0x20] sm:$0xff]  ;;  %1308 = vst [vmem:[%s1958_s15] sm:$0xff] %v1307_v24  ;;  %1310 = vst [vmem:[%s1958_s15 + $0x10] sm:$0xff] %v1309_v25  ;;  %v1313_v27 = vld [vmem:[%s1962_s20 + $0x30] sm:$0xff]  ;;  %p1372_p11 = scmp.ge.s32.totalorder %s1371_s22, %s2487_s18  ;;  %p1300_p12 = scmp.ge.s32.totalorder %s1301_s21, %s2487_s18 }
 0x21d   : >> { %1312 = vst [vmem:[%s1958_s15 + $0x20] sm:$0xff] %v1311_v26  ;;  %v1315_v28 = vld [vmem:[%s1962_s20 + $0x40] sm:$0xff]  ;;  %v1317_v29 = vld [vmem:[%s1962_s20 + $0x50] sm:$0xff]  ;;  %1314 = vst [vmem:[%s1958_s15 + $0x30] sm:$0xff] %v1313_v27 }
 0x21e   : >> { %1316 = vst [vmem:[%s1958_s15 + $0x40] sm:$0xff] %v1315_v28  ;;  %1318 = vst [vmem:[%s1958_s15 + $0x50] sm:$0xff] %v1317_v29  ;;  %v1319_v30 = vld [vmem:[%s1962_s20 + $0x60] sm:$0xff]  ;;  %v1321_v31 = vld [vmem:[%s1962_s20 + $0x70] sm:$0xff]  ;;  %s2633_s22 = smov (%p1372_p11, %s1371_s22), 0 }
 0x21f   : >> { %v1323_v32 = vld [vmem:[%s1962_s20 + $0x80] sm:$0xff]  ;;  %1320 = vst [vmem:[%s1958_s15 + $0x60] sm:$0xff] %v1319_v30  ;;  %1322 = vst [vmem:[%s1958_s15 + $0x70] sm:$0xff] %v1321_v31  ;;  %v1325_v33 = vld [vmem:[%s1962_s20 + $0x90] sm:$0xff]  ;;  %s1581_s23 = sshll.u32 %s2633_s22, 8  ;;  %s2626_s5 = smov %s2633_s22 }
 0x220   : >> { %1324 = vst [vmem:[%s1958_s15 + $0x80] sm:$0xff] %v1323_v32  ;;  %v1327_v34 = vld [vmem:[%s1962_s20 + $0xa0] sm:$0xff]  ;;  %v1329_v35 = vld [vmem:[%s1962_s20 + $0xb0] sm:$0xff]  ;;  %1326 = vst [vmem:[%s1958_s15 + $0x90] sm:$0xff] %v1325_v33  ;;  %s2554_s24 = scalar_lea.vmem %s2424_s8, %s1581_s23 [#allocation2]   ;;  %s1377_s25 = scalar_lea.vmem %s2481_s14, %s1581_s23  }
 0x221   : >> { %1328 = vst [vmem:[%s1958_s15 + $0xa0] sm:$0xff] %v1327_v34  ;;  %1330 = vst [vmem:[%s1958_s15 + $0xb0] sm:$0xff] %v1329_v35  ;;  %v1331_v36 = vld [vmem:[%s1962_s20 + $0xc0] sm:$0xff]  ;;  %v1333_v37 = vld [vmem:[%s1962_s20 + $0xd0] sm:$0xff] }
 0x222   : >> { %v1335_v38 = vld [vmem:[%s1962_s20 + $0xe0] sm:$0xff]  ;;  %1332 = vst [vmem:[%s1958_s15 + $0xc0] sm:$0xff] %v1331_v36  ;;  %1334 = vst [vmem:[%s1958_s15 + $0xd0] sm:$0xff] %v1333_v37  ;;  %v1337_v39 = vld [vmem:[%s1962_s20 + $0xf0] sm:$0xff] }
 0x223   : >> { %1336 = vst [vmem:[%s1958_s15 + $0xe0] sm:$0xff] %v1335_v38  ;;  %v1341_v41 = vld [vmem:[%s1962_s20 + $0x18] sm:$0xff]  ;;  %1338 = vst [vmem:[%s1958_s15 + $0xf0] sm:$0xff] %v1337_v39  ;;  %v1343_v42 = vld [vmem:[%s1962_s20 + $0x28] sm:$0xff] }
 0x224   : >> { %1340 = vst [vmem:[%s1958_s15 + $0x8] sm:$0xff] %v1339_v40  ;;  %1342 = vst [vmem:[%s1958_s15 + $0x18] sm:$0xff] %v1341_v41  ;;  %v1345_v43 = vld [vmem:[%s1962_s20 + $0x38] sm:$0xff]  ;;  %v1347_v44 = vld [vmem:[%s1962_s20 + $0x48] sm:$0xff] }
 0x225   : >> { %1344 = vst [vmem:[%s1958_s15 + $0x28] sm:$0xff] %v1343_v42  ;;  %1346 = vst [vmem:[%s1958_s15 + $0x38] sm:$0xff] %v1345_v43  ;;  %v1349_v45 = vld [vmem:[%s1962_s20 + $0x58] sm:$0xff]  ;;  %v1351_v46 = vld [vmem:[%s1962_s20 + $0x68] sm:$0xff]  ;;  %1303 = sbr.rel (!%p1300_p12) target bundleno = 539 (0x21b), region = 94 }
 0x226   : >> { %1348 = vst [vmem:[%s1958_s15 + $0x48] sm:$0xff] %v1347_v44  ;;  %v1353_v47 = vld [vmem:[%s1962_s20 + $0x78] sm:$0xff]  ;;  %1350 = vst [vmem:[%s1958_s15 + $0x58] sm:$0xff] %v1349_v45  ;;  %v1355_v48 = vld [vmem:[%s1962_s20 + $0x88] sm:$0xff] }
 0x227   : >> { %1352 = vst [vmem:[%s1958_s15 + $0x68] sm:$0xff] %v1351_v46  ;;  %1354 = vst [vmem:[%s1958_s15 + $0x78] sm:$0xff] %v1353_v47  ;;  %v1357_v49 = vld [vmem:[%s1962_s20 + $0x98] sm:$0xff]  ;;  %v1359_v50 = vld [vmem:[%s1962_s20 + $0xa8] sm:$0xff] }
 0x228   : >> { %1356 = vst [vmem:[%s1958_s15 + $0x88] sm:$0xff] %v1355_v48  ;;  %1358 = vst [vmem:[%s1958_s15 + $0x98] sm:$0xff] %v1357_v49  ;;  %v1361_v51 = vld [vmem:[%s1962_s20 + $0xb8] sm:$0xff]  ;;  %v1363_v52 = vld [vmem:[%s1962_s20 + $0xc8] sm:$0xff] }
 0x229   : >> { %1360 = vst [vmem:[%s1958_s15 + $0xa8] sm:$0xff] %v1359_v50  ;;  %v1365_v53 = vld [vmem:[%s1962_s20 + $0xd8] sm:$0xff]  ;;  %1362 = vst [vmem:[%s1958_s15 + $0xb8] sm:$0xff] %v1361_v51  ;;  %v1367_v54 = vld [vmem:[%s1962_s20 + $0xe8] sm:$0xff] }
 0x22a   : >> { %1364 = vst [vmem:[%s1958_s15 + $0xc8] sm:$0xff] %v1363_v52  ;;  %1366 = vst [vmem:[%s1958_s15 + $0xd8] sm:$0xff] %v1365_v53  ;;  %v1369_v55 = vld [vmem:[%s1962_s20 + $0xf8] sm:$0xff]  ;;  %s2625_s20 = smov %s2554_s24 }
 0x22b   : >> { %1368 = vst [vmem:[%s1958_s15 + $0xe8] sm:$0xff] %v1367_v54  ;;  %1370 = vst [vmem:[%s1958_s15 + $0xf8] sm:$0xff] %v1369_v55  ;;  %s2624_s15 = smov %s1377_s25 }
 0x22c PF: > { %s2595_s26 = sand.u32 15, %s2631_s12   ;;  %s1594_s27 = sshll.u32 %s2487_s18, 8 }
 0x22d   : > { %s2599_s28 = scalar_lea.vmem %s2424_s8, %s1594_s27 [#allocation2]   ;;  %s1384_s29 = scalar_lea.vmem %s2481_s14, %s1594_s27  }
 0x22e   : > { %p1586_p13 = scmp.le.s32.totalorder %s2595_s26, 0 }
 0x22f   : > { %s1972_s30 = smov (!%p1586_p13), %s1384_s29   ;;  %s1976_s4 = smov (!%p1586_p13), %s2599_s28  }
 0x230   : > { %1465 = sbr.rel (%p1586_p13) target bundleno = 577 (0x241), region = 99  ;;  %s1980_s6 = smov (!%p1586_p13), 0  }
 0x231   : > { %s1984_s7 = smov (!%p1586_p13), 0  }
 0x237 LB: >> { %v1394_v56 = vld [vmem:[%s1978_s4] sm:$0xff]  ;;  %v1396_v57 = vld [vmem:[%s1978_s4 + $0x8] sm:$0xff]  ;;  %s1398_s8 = sadd.s32 1, %s1982_s6  ;;  %s1388_s7 = sadd.s32 1, %s1986_s7   ;;  %s1986_s7 = sphi %s1984_s7, %s1388_s7   ;;  %s1982_s6 = sphi %s1980_s6, %s1981_s6   ;;  %s1978_s4 = sphi %s1976_s4, %s1403_s4   ;;  %s1974_s30 = sphi %s1972_s30, %s1404_s30  }
 0x238   : >> { %1395 = vst [vmem:[%s1974_s30] sm:$0xff] %v1394_v56  ;;  %1397 = vst [vmem:[%s1974_s30 + $0x8] sm:$0xff] %v1396_v57  ;;  %p1399_p0 = scmp.ge.s32.totalorder %s1398_s8, %s2595_s26  ;;  %p1387_p1 = scmp.ge.s32.totalorder %s1388_s7, %s2595_s26 }
 0x23a   : >> { %s2635_s8 = smov (%p1399_p0, %s1398_s8), 0  ;;  %1390 = sbr.rel (!%p1387_p1) target bundleno = 567 (0x237), region = 105 }
 0x23b   : >> { %s1587_s12 = sshll.u32 %s2635_s8, 4  ;;  %s1981_s6 = smov %s2635_s8  }
 0x23c   : >> { %s1403_s4 = scalar_lea.vmem %s2599_s28, %s1587_s12 [#allocation2]   ;;  %s1404_s30 = scalar_lea.vmem %s1384_s29, %s1587_s12  }
 0x241 PF: > { %p10_p2 = scmp.ge.s32.totalorder %s2024_s16, 5   ;;  %s2627_s12 = smov %s1950_s13 }
 0x242   : > { %s2628_s13 = smov %s2032_s19  ;;  %s2629_s14 = smov %s2024_s16 }
 0x243   :  { %12 = sbr.rel (!%p10_p2) target bundleno = 2 (0x2), region = 116 }

</bundles_post_ra>
